<compile_context>
chip_gen: v7x
topology: tpu7x:2x2x1
jax: 0.10.0
libtpu: 0.0.40
codegen_flags: <defaults>
</compile_context>

<pallas_src>
import jax
import jax.numpy as jnp
from jax.experimental import pallas as pl
from jax.experimental.pallas import tpu as pltpu


# ------------------------------ constants ------------------------------------
CATEGORY_COUNT = {
    "workclass": 9, "education": 16, "education.num": 16, "marital.status": 7,
    "occupation": 15, "relationship": 6, "race": 5, "sex": 2,
    "native.country": 42,
}
CATEGORY_DIM = {
    "workclass": 5, "education": 8, "education.num": 8, "marital.status": 4,
    "occupation": 8, "relationship": 3, "race": 3, "sex": 2,
    "native.country": 10,
}
CAT_ORDER = ["workclass", "education", "education.num", "marital.status",
             "occupation", "relationship", "race", "sex", "native.country"]
CONT_ORDER = ["fnlwgt", "age", "capital.gain", "capital.loss", "hours.per.week"]

TOTAL_DIM = sum(CATEGORY_DIM.values()) + 5      # 56 real input features
HIDDEN = 300                                     # real hidden width
N_CLASSES = 2                                    # real logit width
BN_EPS = 1e-5

D_IN_PAD = 128                                   # 56  -> 128 lanes
D_H_PAD = 384                                    # 300 -> 384 lanes
D_OUT_PAD = 128                                  # 2   -> 128 lanes (lane-dense out)
TB_MAX = 2048                                    # max batch tile (rows)


def _round_up(x, m):
    return (x + m - 1) // m * m


def _pick_tb(B):
    """Power-of-two batch tile in [16, TB_MAX].

    Multiple of 16 => full bf16 sublane packing; grows only while it keeps the
    grid at >= 2 steps, so v7x's two TensorCores both get work and per-step
    overhead is amortized at large B.  Power-of-two quantization avoids a
    recompile per batch size.
    """
    tb = 16
    while tb * 2 <= TB_MAX and tb * 2 < B:
        tb *= 2
    return tb


# ----------------------------- Pallas kernel --------------------------------
def _mlp_kernel(x_ref, w1_ref, b1_ref, w2_ref, b2_ref, w3_ref, b3_ref, o_ref):
    # BN1/BN2 affines are pre-folded into w2/b2, w3/b3; BN0 is applied on the
    # host (folded into embedding tables / continuous scale+shift); Dropout is
    # identity in eval mode.  Dot inputs are bf16, MXU accumulation and the
    # bias/ReLU epilogue are f32 (safe on v5e); the final store is bf16 to
    # halve HBM writeback.
    x = x_ref[...]                                                    # (TB, 128) bf16
    h = jnp.dot(x, w1_ref[...], preferred_element_type=jnp.float32) + b1_ref[...]
    h = jnp.maximum(h, 0.0)
    h = jnp.dot(h.astype(jnp.bfloat16), w2_ref[...],
                preferred_element_type=jnp.float32) + b2_ref[...]
    h = jnp.maximum(h, 0.0)
    o = jnp.dot(h.astype(jnp.bfloat16), w3_ref[...],
                preferred_element_type=jnp.float32) + b3_ref[...]
    o_ref[...] = o.astype(jnp.bfloat16)


def mlp_forward(x, params):
    """Run the folded MLP on a (B, 128) bf16 input; returns (B, 2) f32 logits.

    1-D grid over the batch; weights/biases are single-buffered and held
    resident in VMEM (constant index_map) while activation tiles stream.
    """
    B = x.shape[0]
    TB = _pick_tb(B)
    B_pad = _round_up(B, TB)
    if B_pad != B:
        x = jnp.pad(x, ((0, B_pad - B), (0, 0)))

    grid = (B_pad // TB,)
    const = lambda i: (0, 0)     # weights/biases resident across grid steps
    batch = lambda i: (i, 0)
    resident = dict(pipeline_mode=pl.Buffered(1))   # fetched once, no dbl-buffer

    flops = 2 * B_pad * (D_IN_PAD * D_H_PAD + D_H_PAD * D_H_PAD
                         + D_H_PAD * D_OUT_PAD)
    bytes_accessed = (
        x.size * 2                                    # bf16 input tiles
        + B_pad * D_OUT_PAD * 2                       # bf16 output tiles
        + (params["w1"].size + params["w2"].size + params["w3"].size) * 2
        + (params["b1"].size + params["b2"].size + params["b3"].size) * 4)

    out = pl.pallas_call(
        _mlp_kernel,
        out_shape=jax.ShapeDtypeStruct((B_pad, D_OUT_PAD), jnp.bfloat16),
        grid=grid,
        in_specs=[
            pl.BlockSpec((TB, D_IN_PAD), batch),                     # x tile
            pl.BlockSpec((D_IN_PAD, D_H_PAD), const, **resident),    # w1 bf16
            pl.BlockSpec((1, D_H_PAD), const, **resident),           # b1 f32
            pl.BlockSpec((D_H_PAD, D_H_PAD), const, **resident),     # w2 bf16
            pl.BlockSpec((1, D_H_PAD), const, **resident),           # b2 f32
            pl.BlockSpec((D_H_PAD, D_OUT_PAD), const, **resident),   # w3 bf16
            pl.BlockSpec((1, D_OUT_PAD), const, **resident),         # b3 f32
        ],
        out_specs=pl.BlockSpec((TB, D_OUT_PAD), batch),
        compiler_params=pltpu.CompilerParams(
            dimension_semantics=("parallel",)),
        cost_estimate=pl.CostEstimate(flops=flops, transcendentals=0,
                                      bytes_accessed=bytes_accessed),
    )(x, params["w1"], params["b1"], params["w2"], params["b2"],
      params["w3"], params["b3"])

    return out[:B, :N_CLASSES].astype(jnp.float32)


# -------------------------- model setup (glue) -------------------------------
def init_params(key):
    """Initialize raw PyTorch-style parameters, fold the eval-mode BatchNorms
    (BN0 into embedding tables / continuous scale+shift in f32; BN1/BN2 into
    linear_2 / linear_3), zero-pad to lane multiples, cast weights to bf16."""
    ks = iter(jax.random.split(key, 64))
    p = {}

    # raw embedding tables (nn.Embedding inits ~ N(0,1)), f32 for the BN0 fold
    raw_emb = {name: jax.random.normal(
        next(ks), (CATEGORY_COUNT[name], CATEGORY_DIM[name]), jnp.float32)
        for name in CAT_ORDER}

    def linear(key_w, key_b, d_in, d_out):
        # stored pre-transposed: [in, out] so kernel computes y = x @ W + b
        w = jax.random.normal(key_w, (d_in, d_out), jnp.float32) * 0.05
        b = jax.random.normal(key_b, (1, d_out), jnp.float32) * 0.05
        return w, b

    def bn_fold(key_g, key_b, d):
        # eval-mode BatchNorm1d folded to per-feature scale/shift
        gamma = 1.0 + 0.1 * jax.random.normal(key_g, (1, d), jnp.float32)
        beta = 0.1 * jax.random.normal(key_b, (1, d), jnp.float32)
        running_mean = jnp.zeros((1, d), jnp.float32)
        running_var = jnp.ones((1, d), jnp.float32)
        scale = gamma / jnp.sqrt(running_var + BN_EPS)
        shift = beta - running_mean * scale
        return scale, shift

    s0, t0 = bn_fold(next(ks), next(ks), TOTAL_DIM)
    w1, b1 = linear(next(ks), next(ks), TOTAL_DIM, HIDDEN)
    s1, t1 = bn_fold(next(ks), next(ks), HIDDEN)
    w2, b2 = linear(next(ks), next(ks), HIDDEN, HIDDEN)
    s2, t2 = bn_fold(next(ks), next(ks), HIDDEN)
    w3, b3 = linear(next(ks), next(ks), HIDDEN, N_CLASSES)

    # --- BN0 (input-side) folded, IN F32, into the embedding tables and the
    #     continuous-column scale/shift so the bf16 cast only ever sees
    #     already-normalized activations (precision fix from review). --------
    off = 0
    for name in CAT_ORDER:
        d = CATEGORY_DIM[name]
        p[f"emb_{name}"] = (raw_emb[name] * s0[0, off:off + d]
                            + t0[0, off:off + d]).astype(jnp.bfloat16)
        off += d
    p["bn0_cont_scale"] = s0[0, off:off + 5]        # (5,) f32
    p["bn0_cont_shift"] = t0[0, off:off + 5]        # (5,) f32

    # --- BN1 / BN2 folded into linear_2 / linear_3 ---------------------------
    #   (h*s + t) @ W + b  ==  h @ (diag(s) W) + (t @ W + b)
    w2f = w2 * s1.reshape(-1, 1)
    b2f = b2 + t1 @ w2
    w3f = w3 * s2.reshape(-1, 1)
    b3f = b3 + t2 @ w3

    # --- zero-pad to lane-friendly shapes (padded entries must be exactly 0) -
    def pad2(a, r, c):
        out = jnp.zeros((r, c), jnp.float32)
        return out.at[:a.shape[0], :a.shape[1]].set(a)

    p["w1"] = pad2(w1, D_IN_PAD, D_H_PAD).astype(jnp.bfloat16)
    p["b1"] = pad2(b1, 1, D_H_PAD)                        # f32
    p["w2"] = pad2(w2f, D_H_PAD, D_H_PAD).astype(jnp.bfloat16)
    p["b2"] = pad2(b2f, 1, D_H_PAD)                       # f32
    p["w3"] = pad2(w3f, D_H_PAD, D_OUT_PAD).astype(jnp.bfloat16)
    p["b3"] = pad2(b3f, 1, D_OUT_PAD)                     # f32
    return p


def income_classifier_forward(inputs, params):
    # Embedding lookups (BN0 already folded into the bf16 tables) + BN0-scaled
    # continuous scalars + bf16 zero pad block, concatenated straight into the
    # lane-padded (B, 128) bf16 kernel input — no f32 scratch buffer passes.
    # TODO(synk): fold the 9 gathers + concat into the Pallas kernel (tables
    # total <10 KiB, fit trivially in VMEM) to make the forward a single launch.
    B = inputs[CAT_ORDER[0]].shape[0]
    pieces = [jnp.take(params[f"emb_{name}"], inputs[name], axis=0)
              for name in CAT_ORDER]                                  # bf16
    cont = jnp.stack([inputs[name].astype(jnp.float32) for name in CONT_ORDER],
                     axis=1)                                          # [B, 5] f32
    cont = cont * params["bn0_cont_scale"] + params["bn0_cont_shift"]
    pieces.append(cont.astype(jnp.bfloat16))
    pieces.append(jnp.zeros((B, D_IN_PAD - TOTAL_DIM), jnp.bfloat16))
    x = jnp.concatenate(pieces, axis=1)            # [B, 128] bf16, BN0 applied
    return mlp_forward(x, params)                  # [B, 2] f32 logits


# --------------------------------- main --------------------------------------
if __name__ == "__main__":
    key = jax.random.PRNGKey(0)
    pkey, dkey = jax.random.split(key)
    params = init_params(pkey)

    B = 8
    dkeys = iter(jax.random.split(dkey, 32))
    inputs = {}
    for name in CAT_ORDER:
        inputs[name] = jax.random.randint(
            next(dkeys), (B,), 0, CATEGORY_COUNT[name], dtype=jnp.int32)
    for name in CONT_ORDER:
        inputs[name] = jax.random.normal(next(dkeys), (B,), jnp.float32)

    logits = income_classifier_forward(inputs, params)
    logits = jax.block_until_ready(logits)
    assert logits.shape == (B, 2) and logits.dtype == jnp.float32
    assert bool(jnp.all(jnp.isfinite(logits)))
    print("KERNEL_OK")
</pallas_src>

<mosaic_0001>
module attributes {stable_mosaic.version = 11 : i64} {
  func.func @_mlp_kernel(%arg0: i32, %arg1: memref<16x128xbf16, #tpu.memory_space<vmem>>, %arg2: memref<128x384xbf16, #tpu.memory_space<vmem>>, %arg3: memref<1x384xf32, #tpu.memory_space<vmem>>, %arg4: memref<384x384xbf16, #tpu.memory_space<vmem>>, %arg5: memref<1x384xf32, #tpu.memory_space<vmem>>, %arg6: memref<384x128xbf16, #tpu.memory_space<vmem>>, %arg7: memref<1x128xf32, #tpu.memory_space<vmem>>, %arg8: memref<16x128xbf16, #tpu.memory_space<vmem>>) attributes {dimension_semantics = [#tpu.dimension_semantics<parallel>], iteration_bounds = array<i64: 1>, scalar_prefetch = 0 : i64, scratch_operands = 0 : i64, tpu.core_type = #tpu.core_type<tc>, window_params = [{transform_indices = @transform_0, window_bounds = array<i64: 16, 128>}, {pipeline_mode = #tpu.pipeline_mode<synchronous>, transform_indices = @transform_1, window_bounds = array<i64: 128, 384>}, {pipeline_mode = #tpu.pipeline_mode<synchronous>, transform_indices = @transform_2, window_bounds = array<i64: 1, 384>}, {pipeline_mode = #tpu.pipeline_mode<synchronous>, transform_indices = @transform_3, window_bounds = array<i64: 384, 384>}, {pipeline_mode = #tpu.pipeline_mode<synchronous>, transform_indices = @transform_4, window_bounds = array<i64: 1, 384>}, {pipeline_mode = #tpu.pipeline_mode<synchronous>, transform_indices = @transform_5, window_bounds = array<i64: 384, 128>}, {pipeline_mode = #tpu.pipeline_mode<synchronous>, transform_indices = @transform_6, window_bounds = array<i64: 1, 128>}, {transform_indices = @transform_7, window_bounds = array<i64: 16, 128>}]} {
    %c0 = arith.constant 0 : index
    %c0_0 = arith.constant 0 : index
    %0 = vector.load %arg1[%c0, %c0_0] : memref<16x128xbf16, #tpu.memory_space<vmem>>, vector<16x128xbf16>
    %c0_1 = arith.constant 0 : index
    %c0_2 = arith.constant 0 : index
    %1 = vector.load %arg2[%c0_1, %c0_2] : memref<128x384xbf16, #tpu.memory_space<vmem>>, vector<128x384xbf16>
    %cst = arith.constant dense<0.000000e+00> : vector<16x384xf32>
    %2 = tpu.matmul %0, %1, %cst {dimension_numbers = #tpu.dot_dimension_numbers<[1], [0], [0], [1], [0, 0, 1, 1], [], []>} : vector<16x128xbf16>, vector<128x384xbf16>, vector<16x384xf32> -> vector<16x384xf32>
    %c0_3 = arith.constant 0 : index
    %c0_4 = arith.constant 0 : index
    %3 = vector.load %arg3[%c0_3, %c0_4] : memref<1x384xf32, #tpu.memory_space<vmem>>, vector<1x384xf32>
    %4 = vector.broadcast %3 : vector<1x384xf32> to vector<16x384xf32>
    %5 = arith.addf %2, %4 : vector<16x384xf32>
    %cst_5 = arith.constant 0.000000e+00 : f32
    %6 = vector.broadcast %cst_5 : f32 to vector<16x384xf32>
    %7 = arith.maximumf %5, %6 : vector<16x384xf32>
    %8 = arith.truncf %7 : vector<16x384xf32> to vector<16x384xbf16>
    %c0_6 = arith.constant 0 : index
    %c0_7 = arith.constant 0 : index
    %9 = vector.load %arg4[%c0_6, %c0_7] : memref<384x384xbf16, #tpu.memory_space<vmem>>, vector<384x384xbf16>
    %cst_8 = arith.constant dense<0.000000e+00> : vector<16x384xf32>
    %10 = tpu.matmul %8, %9, %cst_8 {dimension_numbers = #tpu.dot_dimension_numbers<[1], [0], [0], [1], [0, 0, 1, 1], [], []>} : vector<16x384xbf16>, vector<384x384xbf16>, vector<16x384xf32> -> vector<16x384xf32>
    %c0_9 = arith.constant 0 : index
    %c0_10 = arith.constant 0 : index
    %11 = vector.load %arg5[%c0_9, %c0_10] : memref<1x384xf32, #tpu.memory_space<vmem>>, vector<1x384xf32>
    %12 = vector.broadcast %11 : vector<1x384xf32> to vector<16x384xf32>
    %13 = arith.addf %10, %12 : vector<16x384xf32>
    %cst_11 = arith.constant 0.000000e+00 : f32
    %14 = vector.broadcast %cst_11 : f32 to vector<16x384xf32>
    %15 = arith.maximumf %13, %14 : vector<16x384xf32>
    %16 = arith.truncf %15 : vector<16x384xf32> to vector<16x384xbf16>
    %c0_12 = arith.constant 0 : index
    %c0_13 = arith.constant 0 : index
    %17 = vector.load %arg6[%c0_12, %c0_13] : memref<384x128xbf16, #tpu.memory_space<vmem>>, vector<384x128xbf16>
    %cst_14 = arith.constant dense<0.000000e+00> : vector<16x128xf32>
    %18 = tpu.matmul %16, %17, %cst_14 {dimension_numbers = #tpu.dot_dimension_numbers<[1], [0], [0], [1], [0, 0, 1, 1], [], []>} : vector<16x384xbf16>, vector<384x128xbf16>, vector<16x128xf32> -> vector<16x128xf32>
    %c0_15 = arith.constant 0 : index
    %c0_16 = arith.constant 0 : index
    %19 = vector.load %arg7[%c0_15, %c0_16] : memref<1x128xf32, #tpu.memory_space<vmem>>, vector<1x128xf32>
    %20 = vector.broadcast %19 : vector<1x128xf32> to vector<16x128xf32>
    %21 = arith.addf %18, %20 : vector<16x128xf32>
    %22 = arith.truncf %21 : vector<16x128xf32> to vector<16x128xbf16>
    %c0_17 = arith.constant 0 : index
    %c0_18 = arith.constant 0 : index
    %23 = vector.load %arg8[%c0_17, %c0_18] : memref<16x128xbf16, #tpu.memory_space<vmem>>, vector<16x128xbf16>
    tpu.vector_store %arg8[%c0_17, %c0_18], %22 {strides = array<i32>} : memref<16x128xbf16, #tpu.memory_space<vmem>>, vector<16x128xbf16>,
    return
  }
  func.func @transform_0(%arg0: i32) -> (i32, i32) {
    %c0_i32 = arith.constant 0 : i32
    %c0_i32_0 = arith.constant 0 : i32
    return %arg0, %c0_i32 : i32, i32
  }
  func.func @transform_1(%arg0: i32) -> (i32, i32) {
    %c0_i32 = arith.constant 0 : i32
    %c0_i32_0 = arith.constant 0 : i32
    %c0_i32_1 = arith.constant 0 : i32
    return %c0_i32, %c0_i32_0 : i32, i32
  }
  func.func @transform_2(%arg0: i32) -> (i32, i32) {
    %c0_i32 = arith.constant 0 : i32
    %c0_i32_0 = arith.constant 0 : i32
    %c0_i32_1 = arith.constant 0 : i32
    return %c0_i32, %c0_i32_0 : i32, i32
  }
  func.func @transform_3(%arg0: i32) -> (i32, i32) {
    %c0_i32 = arith.constant 0 : i32
    %c0_i32_0 = arith.constant 0 : i32
    %c0_i32_1 = arith.constant 0 : i32
    return %c0_i32, %c0_i32_0 : i32, i32
  }
  func.func @transform_4(%arg0: i32) -> (i32, i32) {
    %c0_i32 = arith.constant 0 : i32
    %c0_i32_0 = arith.constant 0 : i32
    %c0_i32_1 = arith.constant 0 : i32
    return %c0_i32, %c0_i32_0 : i32, i32
  }
  func.func @transform_5(%arg0: i32) -> (i32, i32) {
    %c0_i32 = arith.constant 0 : i32
    %c0_i32_0 = arith.constant 0 : i32
    %c0_i32_1 = arith.constant 0 : i32
    return %c0_i32, %c0_i32_0 : i32, i32
  }
  func.func @transform_6(%arg0: i32) -> (i32, i32) {
    %c0_i32 = arith.constant 0 : i32
    %c0_i32_0 = arith.constant 0 : i32
    %c0_i32_1 = arith.constant 0 : i32
    return %c0_i32, %c0_i32_0 : i32, i32
  }
  func.func @transform_7(%arg0: i32) -> (i32, i32) {
    %c0_i32 = arith.constant 0 : i32
    %c0_i32_0 = arith.constant 0 : i32
    return %arg0, %c0_i32 : i32, i32
  }
}

</mosaic_0001>

<bundles_post_ra>
// kernel: tpu_custom_call.1
= control target key start
LH: loop header
LB: loop body
LE: loop exit
PB: predicated region body
PF: predicated region fallthrough
CT: control target
= control target key end

     0   :  { %12 = vsyncpa [#allocation3], 0  ;;  %s2090_s0 = inlined_call_operand.hbm [shape: bf16[16,128], index: 0, kind: input, shape index: {}]   ;;  %s2091_s1 = inlined_call_operand.hbm [shape: bf16[128,384], index: 1, kind: input, shape index: {}]   ;;  %s2092_s2 = inlined_call_operand.vmem [shape: f32[1,384], index: 2, kind: input, shape index: {}]   ;;  %s2093_s3 = inlined_call_operand.hbm [shape: bf16[384,384], index: 3, kind: input, shape index: {}]   ;;  %s2094_s4 = inlined_call_operand.vmem [shape: f32[1,384], index: 4, kind: input, shape index: {}]   ;;  %s2095_s5 = inlined_call_operand.hbm [shape: bf16[384,128], index: 5, kind: input, shape index: {}]   ;;  %s2096_s6 = inlined_call_operand.vmem [shape: f32[1,128], index: 6, kind: input, shape index: {}]   ;;  %s2097_s7 = inlined_call_operand.hbm [shape: bf16[16,128], index: 7, kind: output, shape index: {}]  }
   0x1   :  { %13 = vsyncpa [#allocation6], 0 }
   0x2   :  { %14 = vsyncpa [#allocation9], 0 }
   0x3   :  { %15 = vsyncpa [#allocation4], 0  ;;  %s1898_s24 = smov [#allocation5]   ;;  %s1780_s28 = scalar_lea.hbm %s2091_s1, 3072 }
   0x4   :  { %s33_s25 = sshll.u32 %s1898_s24, 4  ;;  %p1781_p0 = scmp.ne.s32.totalorder %s2091_s1, %s1780_s28  ;;  %s34_s25 = int_to_ptr.vmem [resolvable:$true] %s33_s25 }
   0x5   :  { %p1784_p1 = scmp.lt.u32.totalorder %s1780_s28, %s2091_s1 }
   0x7   :  { %p1786_p2 = pnand %p1784_p1, %p1781_p0 }
   0x9   :  { %1789 = shalt.err (!%p1786_p2)
}
   0xa   :  { %s1790_s10 = scalar_lea.vmem %s34_s25, 3072  ;;  %p1795_p4 = scmp.lt.s32.totalorder %s34_s25, %s34_s25 }
   0xb   :  { %p1791_p3 = scmp.ne.s32.totalorder %s34_s25, %s1790_s10  ;;  %p1796_p5 = scmp.lt.s32.totalorder %s1790_s10, %s1790_s10 }
   0xd   :  { %p1797_p6 = por %p1796_p5, %p1795_p4 }
   0xf   :  { %p1798_p7 = pnand %p1797_p6, %p1791_p3 }
  0x11   :  { %1801 = shalt.err (!%p1798_p7)
}
  0x12   :  { %s1899_s11 = smov 192   ;;  %s1900_s12 = smov 12  }
  0x13   :  { %39 = dma.hbm_to_vmem [thread:$0]  %s2091_s1, 3072, %s34_s25, [#allocation6], %s1899_s11, %s1899_s11, %s1900_s12  }
  0x14   :  { %s1901_s15 = smov [#allocation2]   ;;  %s1802_s19 = scalar_lea.hbm %s2090_s0, 128 }
  0x15   :  { %s21_s16 = sshll.u32 %s1901_s15, 4  ;;  %p1803_p8 = scmp.ne.s32.totalorder %s2090_s0, %s1802_s19  ;;  %s22_s16 = int_to_ptr.vmem [resolvable:$true] %s21_s16 }
  0x16   :  { %p1806_p9 = scmp.lt.u32.totalorder %s1802_s19, %s2090_s0 }
  0x18   :  { %p1808_p10 = pnand %p1806_p9, %p1803_p8 }
  0x1a   :  { %1811 = shalt.err (!%p1808_p10)
}
  0x1b   :  { %s1812_s24 = scalar_lea.vmem %s22_s16, 128  ;;  %p1817_p12 = scmp.lt.s32.totalorder %s22_s16, %s22_s16 }
  0x1c   :  { %p1813_p11 = scmp.ne.s32.totalorder %s22_s16, %s1812_s24  ;;  %p1818_p13 = scmp.lt.s32.totalorder %s1812_s24, %s1812_s24 }
  0x1e   :  { %p1819_p0 = por %p1818_p13, %p1817_p12 }
  0x20   :  { %p1820_p1 = pnand %p1819_p0, %p1813_p11 }
  0x22   :  { %1823 = shalt.err (!%p1820_p1)
}
  0x23   :  { %s1902_s1 = smov 64   ;;  %s1903_s25 = smov 4  }
  0x24   :  { %27 = dma.hbm_to_vmem [thread:$0]  %s2090_s0, 128, %s22_s16, [#allocation3], %s1902_s1, %s1902_s1, %s1903_s25  }
  0x25   :  { %s1904_s28 = smov [#allocation7]   ;;  %s1905_s30 = smov [#allocation8]  }
  0x26   :  { %s47_s29 = sshll.u32 %s1904_s28, 4  ;;  %s61_s8 = sshll.u32 %s1905_s30, 4  ;;  %s48_s29 = int_to_ptr.vmem [resolvable:$true] %s47_s29  ;;  %s1980_s8 = int_to_ptr.vmem [resolvable:$true] %s61_s8 }
  0x27   :  { %s1824_s13 = scalar_lea.hbm %s2093_s3, 9216 }
  0x28   :  { %p1825_p2 = scmp.ne.s32.totalorder %s2093_s3, %s1824_s13  ;;  %p1828_p3 = scmp.lt.u32.totalorder %s1824_s13, %s2093_s3 }
  0x2a   :  { %p1830_p4 = pnand %p1828_p3, %p1825_p2 }
  0x2c   :  { %1833 = shalt.err (!%p1830_p4)
}
  0x2d   :  { %s1834_s0 = scalar_lea.vmem %s48_s29, 9216  ;;  %p1839_p6 = scmp.lt.s32.totalorder %s48_s29, %s48_s29 }
  0x2e   :  { %p1835_p5 = scmp.ne.s32.totalorder %s48_s29, %s1834_s0  ;;  %p1840_p7 = scmp.lt.s32.totalorder %s1834_s0, %s1834_s0 }
  0x30   :  { %p1841_p8 = por %p1840_p7, %p1839_p6 }
  0x32   :  { %p1842_p9 = pnand %p1841_p8, %p1835_p5 }
  0x34   :  { %1845 = shalt.err (!%p1842_p9)
}
  0x35   :  { %53 = dma.hbm_to_vmem [thread:$0]  %s2093_s3, 9216, %s48_s29, [#allocation6], %s1899_s11, %s1899_s11, %s1900_s12  }
  0x36   :  { %s1846_s22 = scalar_lea.hbm %s2095_s5, 3072 }
  0x37   :  { %p1847_p10 = scmp.ne.s32.totalorder %s2095_s5, %s1846_s22  ;;  %p1850_p11 = scmp.lt.u32.totalorder %s1846_s22, %s2095_s5 }
  0x39   :  { %p1852_p12 = pnand %p1850_p11, %p1847_p10 }
  0x3b   :  { %1855 = shalt.err (!%p1852_p12)
}
  0x3c   :  { %s1856_s28 = scalar_lea.vmem %s1980_s8, 3072  ;;  %p1861_p0 = scmp.lt.s32.totalorder %s1980_s8, %s1980_s8 }
  0x3d   :  { %p1857_p13 = scmp.ne.s32.totalorder %s1980_s8, %s1856_s28  ;;  %p1862_p1 = scmp.lt.s32.totalorder %s1856_s28, %s1856_s28 }
  0x3f   :  { %p1863_p2 = por %p1862_p1, %p1861_p0 }
  0x41   :  { %p1864_p3 = pnand %p1863_p2, %p1857_p13 }
  0x43   :  { %1867 = shalt.err (!%p1864_p3)
}
  0x44   :  { %67 = dma.hbm_to_vmem [thread:$0]  %s2095_s5, 3072, %s1980_s8, [#allocation9], %s1902_s1, %s1902_s1, %s1903_s25  }
  0x45   :  { %1890 = dma.done.wait [#allocation3], 128  }
  0x46   :  { %1891 = vsyncadd [#allocation3], 4294967168 }
  0x47   :  { %1892 = dma.done.wait [#allocation6], 12288  }
  0x48   :  { %1893 = vsyncadd [#allocation6], 4294955008 }
  0x49   :  { %1894 = dma.done.wait [#allocation9], 3072  }
  0x4a   :  { %1895 = vsyncadd [#allocation9], 4294964224  ;;  %v1906_v0 = vmov 0.0   ;;  %v1907_v1 = vmov 0   ;;  %vm1908_vm0 = vmmov 0   ;;  %v1652_v25 = vld [vmem:[#allocation2] sm:$0xff]  }
  0x4b   :  { %1547 = vmatprep.subr.bf16.mxu1 %v1906_v0  ;;  %300 = vmatprep.mubr.bf16.mxu0 %v1907_v1  ;;  %v1627_v2 = vld [vmem:[#allocation5 + $0x4] ss:$12 sps:$4 sm:$0xff]   ;;  %v1629_v3 = vld [vmem:[#allocation5] ss:$12 sps:$4 sm:$0xff]   ;;  %v1630_v4 = vld [vmem:[#allocation5 + $0x1c] ss:$12 sps:$4 sm:$0xff]  }
  0x4c   :  { %1563 = vmatprep.mubr.msk.bf16.mxu1 %vm1908_vm0, %v1906_v0  ;;  %268 = vmatprep.subr.bf16.mxu0 %v1627_v2  ;;  %v1632_v5 = vld [vmem:[#allocation5 + $0x18] ss:$12 sps:$4 sm:$0xff]   ;;  %v1633_v6 = vld [vmem:[#allocation5 + $0x34] ss:$12 sps:$4 sm:$0xff]   ;;  %v1635_v7 = vld [vmem:[#allocation5 + $0x30] ss:$12 sps:$4 sm:$0xff]  }
  0x4d   :  { %269 = vmatpush1.bf16.msra.mxu0 %v1629_v3  ;;  %v1636_v8 = vld [vmem:[#allocation5 + $0x4c] ss:$12 sps:$4 sm:$0xff]   ;;  %v1638_v9 = vld [vmem:[#allocation5 + $0x48] ss:$12 sps:$4 sm:$0xff]   ;;  %v1639_v11 = vld [vmem:[#allocation5 + $0x64] ss:$12 sps:$4 sm:$0xff]  }
  0x4e   :  { %270 = vmatprep.subr.bf16.mxu0 %v1630_v4  ;;  %v1651_v10 = vld [vmem:[#allocation5 + $0x8] ss:$12 sps:$4 sm:$0xff]   ;;  %v1653_v12 = vld [vmem:[#allocation5 + $0x20] ss:$12 sps:$4 sm:$0xff]   ;;  %v1654_v15 = vld [vmem:[#allocation5 + $0x38] ss:$12 sps:$4 sm:$0xff]  }
  0x4f   :  { %1548 = vmatpush3.bf16.msra.mxu1 %v1651_v10  ;;  %v1641_v13 = vld [vmem:[#allocation5 + $0x60] ss:$12 sps:$4 sm:$0xff]   ;;  %v1642_v14 = vld [vmem:[#allocation5 + $0x7c] ss:$12 sps:$4 sm:$0xff]   ;;  %v1644_v16 = vld [vmem:[#allocation5 + $0x78] ss:$12 sps:$4 sm:$0xff]  }
  0x50   :  { %1549 = vmatprep.subr.bf16.mxu1 %v1906_v0  ;;  %v1645_v17 = vld [vmem:[#allocation5 + $0x94] ss:$12 sps:$4 sm:$0xff]   ;;  %v1655_v18 = vld [vmem:[#allocation5 + $0x50] ss:$12 sps:$4 sm:$0xff]   ;;  %v1648_v20 = vld [vmem:[#allocation5 + $0xac] ss:$12 sps:$4 sm:$0xff]  }
  0x51   :  { %271 = vmatpush1.bf16.msra.mxu0 %v1632_v5  ;;  %v1647_v19 = vld [vmem:[#allocation5 + $0x90] ss:$12 sps:$4 sm:$0xff]   ;;  %v1656_v21 = vld [vmem:[#allocation5 + $0x68] ss:$12 sps:$4 sm:$0xff]   ;;  %v1657_v24 = vld [vmem:[#allocation5 + $0x80] ss:$12 sps:$4 sm:$0xff]  }
  0x52   :  { %272 = vmatprep.subr.bf16.mxu0 %v1633_v6  ;;  %v1650_v22 = vld [vmem:[#allocation5 + $0xa8] ss:$12 sps:$4 sm:$0xff]   ;;  %v1662_v23 = vld [vmem:[#allocation7 + $0x4] ss:$12 sps:$4 sm:$0xff]   ;;  %v1660_v26 = vld [vmem:[#allocation7] ss:$12 sps:$4 sm:$0xff]  }
  0x53   :  { %1550 = vmatpush3.bf16.msra.mxu1 %v1653_v12  ;;  %v1665_v27 = vld [vmem:[#allocation7 + $0x1c] ss:$12 sps:$4 sm:$0xff]   ;;  %v1658_v28 = vld [vmem:[#allocation5 + $0x98] ss:$12 sps:$4 sm:$0xff]   ;;  %v1668_v30 = vld [vmem:[#allocation7 + $0x34] ss:$12 sps:$4 sm:$0xff]  }
  0x54   :  { %1551 = vmatprep.subr.bf16.mxu1 %v1906_v0  ;;  %v1663_v29 = vld [vmem:[#allocation7 + $0x18] ss:$12 sps:$4 sm:$0xff]   ;;  %v1659_v31 = vld [vmem:[#allocation5 + $0xb0] ss:$12 sps:$4 sm:$0xff]   ;;  %v1687_v32 = vld [vmem:[#allocation7 + $0xc8] ss:$12 sps:$4 sm:$0xff]  }
  0x55   :  { %273 = vmatpush1.bf16.msra.mxu0 %v1635_v7  ;;  %v1666_v33 = vld [vmem:[#allocation7 + $0x30] ss:$12 sps:$4 sm:$0xff]   ;;  %v1671_v34 = vld [vmem:[#allocation7 + $0x4c] ss:$12 sps:$4 sm:$0xff]   ;;  %v1688_v35 = vld [vmem:[#allocation7 + $0x8] ss:$12 sps:$4 sm:$0xff]  }
  0x56   :  { %274 = vmatprep.subr.bf16.mxu0 %v1636_v8  ;;  %v1692_v36 = vld [vmem:[#allocation7 + $0xe0] ss:$12 sps:$4 sm:$0xff]   ;;  %v1669_v37 = vld [vmem:[#allocation7 + $0x48] ss:$12 sps:$4 sm:$0xff]   ;;  %v1674_v38 = vld [vmem:[#allocation7 + $0x64] ss:$12 sps:$4 sm:$0xff]  }
  0x57   :  { %1552 = vmatpush3.bf16.msra.mxu1 %v1654_v15  ;;  %v1693_v39 = vld [vmem:[#allocation7 + $0x20] ss:$12 sps:$4 sm:$0xff]   ;;  %v1697_v40 = vld [vmem:[#allocation7 + $0xf8] ss:$12 sps:$4 sm:$0xff]   ;;  %v1677_v42 = vld [vmem:[#allocation7 + $0x7c] ss:$12 sps:$4 sm:$0xff]  }
  0x58   :  { %1553 = vmatprep.subr.bf16.mxu1 %v1906_v0  ;;  %v1672_v41 = vld [vmem:[#allocation7 + $0x60] ss:$12 sps:$4 sm:$0xff]   ;;  %v1675_v43 = vld [vmem:[#allocation7 + $0x78] ss:$12 sps:$4 sm:$0xff]   ;;  %v1702_v46 = vld [vmem:[#allocation7 + $0x110] ss:$12 sps:$4 sm:$0xff]  }
  0x59   :  { %275 = vmatpush1.bf16.msra.mxu0 %v1638_v9  ;;  %v1698_v44 = vld [vmem:[#allocation7 + $0x38] ss:$12 sps:$4 sm:$0xff]   ;;  %v1680_v45 = vld [vmem:[#allocation7 + $0x94] ss:$12 sps:$4 sm:$0xff]   ;;  %v1703_v47 = vld [vmem:[#allocation7 + $0x50] ss:$12 sps:$4 sm:$0xff]  }
  0x5a   :  { %276 = vmatprep.subr.bf16.mxu0 %v1639_v11  ;;  %v1707_v48 = vld [vmem:[#allocation7 + $0x128] ss:$12 sps:$4 sm:$0xff]   ;;  %v1678_v49 = vld [vmem:[#allocation7 + $0x90] ss:$12 sps:$4 sm:$0xff]   ;;  %v1683_v50 = vld [vmem:[#allocation7 + $0xac] ss:$12 sps:$4 sm:$0xff]  }
  0x5b   :  { %1554 = vmatpush3.bf16.msra.mxu1 %v1655_v18  ;;  %v1708_v51 = vld [vmem:[#allocation7 + $0x68] ss:$12 sps:$4 sm:$0xff]   ;;  %v1712_v52 = vld [vmem:[#allocation7 + $0x140] ss:$12 sps:$4 sm:$0xff]   ;;  %v1686_v54 = vld [vmem:[#allocation7 + $0xc4] ss:$12 sps:$4 sm:$0xff]  }
  0x5c   :  { %1555 = vmatprep.subr.bf16.mxu1 %v1906_v0  ;;  %v1681_v53 = vld [vmem:[#allocation7 + $0xa8] ss:$12 sps:$4 sm:$0xff]   ;;  %v1713_v55 = vld [vmem:[#allocation7 + $0x80] ss:$12 sps:$4 sm:$0xff]   ;;  %v1689_v58 = vld [vmem:[#allocation7 + $0xd8] ss:$12 sps:$4 sm:$0xff]  }
  0x5d   :  { %277 = vmatpush1.bf16.msra.mxu0 %v1641_v13  ;;  %v1684_v56 = vld [vmem:[#allocation7 + $0xc0] ss:$12 sps:$4 sm:$0xff]   ;;  %v1691_v57 = vld [vmem:[#allocation7 + $0xdc] ss:$12 sps:$4 sm:$0xff]   ;;  %v1706_v63 = vld [vmem:[#allocation7 + $0x124] ss:$12 sps:$4 sm:$0xff]  }
  0x5e   :  { %278 = vmatprep.subr.bf16.mxu0 %v1642_v14  ;;  %v1696_v59 = vld [vmem:[#allocation7 + $0xf4] ss:$12 sps:$4 sm:$0xff]   ;;  %v1694_v60 = vld [vmem:[#allocation7 + $0xf0] ss:$12 sps:$4 sm:$0xff]   ;;  %v1701_v61 = vld [vmem:[#allocation7 + $0x10c] ss:$12 sps:$4 sm:$0xff]   ;;  %v119_v14 = vlaneseq }
  0x5f   :  { %1556 = vmatpush3.bf16.msra.mxu1 %v1656_v21  ;;  %v1699_v62 = vld [vmem:[#allocation7 + $0x108] ss:$12 sps:$4 sm:$0xff]   ;;  %v1704_v2 = vld [vmem:[#allocation7 + $0x120] ss:$12 sps:$4 sm:$0xff]   ;;  %v1709_v4 = vld [vmem:[#allocation7 + $0x138] ss:$12 sps:$4 sm:$0xff]  }
  0x60   :  { %1557 = vmatprep.subr.bf16.mxu1 %v1906_v0  ;;  %v1711_v3 = vld [vmem:[#allocation7 + $0x13c] ss:$12 sps:$4 sm:$0xff]   ;;  %v1716_v5 = vld [vmem:[#allocation7 + $0x154] ss:$12 sps:$4 sm:$0xff]   ;;  %v1717_v6 = vld [vmem:[#allocation7 + $0x158] ss:$12 sps:$4 sm:$0xff]  }
  0x61   :  { %279 = vmatpush1.bf16.msra.mxu0 %v1644_v16  ;;  %v1714_v7 = vld [vmem:[#allocation7 + $0x150] ss:$12 sps:$4 sm:$0xff]   ;;  %v1718_v8 = vld [vmem:[#allocation7 + $0x98] ss:$12 sps:$4 sm:$0xff]   ;;  %v1719_v11 = vld [vmem:[#allocation7 + $0x168] ss:$12 sps:$4 sm:$0xff]  }
  0x62   :  { %280 = vmatprep.subr.bf16.mxu0 %v1645_v17  ;;  %v1721_v9 = vld [vmem:[#allocation7 + $0x16c] ss:$12 sps:$4 sm:$0xff]   ;;  %v1722_v10 = vld [vmem:[#allocation7 + $0x170] ss:$12 sps:$4 sm:$0xff]   ;;  %v2029_v15 = vshrl.u32 %v119_v14, 7  ;;  %s1909_s8 = smov [#allocation10]  }
  0x63   :  { %1558 = vmatpush3.bf16.msra.mxu1 %v1657_v24  ;;  %v1723_v12 = vld [vmem:[#allocation7 + $0xb0] ss:$12 sps:$4 sm:$0xff]   ;;  %v117_v17 = vld [vmem:[%s2092_s2] sm:$0x7]  ;;  %s1331_s9 = sshll.u32 %s1909_s8, 4  ;;  %s1332_s9 = int_to_ptr.vmem [resolvable:$true] %s1331_s9 }
  0x64   :  { %1559 = vmatprep.subr.bf16.mxu1 %v1906_v0  ;;  %v1726_v13 = vld [vmem:[#allocation7 + $0x184] ss:$12 sps:$4 sm:$0xff]   ;;  %v121_v16 = vsub.s32 0, %v2029_v15  ;;  %v125_v18 = vsub.s32 1, %v2029_v15  ;;  %s1868_s10 = scalar_lea.vmem %s1332_s9, 128  ;;  %p1873_p5 = scmp.lt.s32.totalorder %s1332_s9, %s1332_s9 }
  0x65   :  { %281 = vmatpush1.bf16.msra.mxu0 %v1647_v19  ;;  %v1764_v14 = vld [vmem:[#allocation8 + $0x10] sm:$0xff]   ;;  %p1869_p4 = scmp.ne.s32.totalorder %s1332_s9, %s1868_s10  ;;  %p1874_p6 = scmp.lt.s32.totalorder %s1868_s10, %s1868_s10 }
  0x66   :  { %282 = vmatprep.subr.bf16.mxu0 %v1648_v20  ;;  %v122_v19 = vrot.slane %v117_v17, %v121_v16  ;;  %v126_v20 = vrot.slane %v117_v17, %v125_v18 }
  0x67   :  { %1560 = vmatpush3.bf16.msra.mxu1 %v1658_v28  ;;  %v129_v28 = vsub.s32 2, %v2029_v15  ;;  %p1875_p7 = por %p1874_p6, %p1873_p5 }
  0x68   :  { %1561 = vmatprep.subr.bf16.mxu1 %v1906_v0 }
  0x69   :  { %283 = vmatpush1.bf16.msra.mxu0 %v1650_v22  ;;  %p1876_p8 = pnand %p1875_p7, %p1869_p4 }
  0x6a   :  { %858 = vmatprep.subr.bf16.mxu0 %v1662_v23 }
  0x6b   :  { %1562 = vmatpush3.bf16.msra.mxu1 %v1659_v31 }
  0x6c   :  { %301 = vmatmul.mubr.bf16.vlgmr.msra.gmra.mrb[0].mxu0 %v1652_v25  ;;  %1485 = vmatprep.subr.bf16.mxu1 %v1687_v32 }
  0x6d   :  { %859 = vmatpush1.bf16.msra.mxu0 %v1660_v26 }
  0x6e   :  { %860 = vmatprep.subr.bf16.mxu0 %v1665_v27  ;;  %1564 = vmatmul.mubr.bf16.vlgmr.msra.gmra.mrb[0].mxu1 %v1652_v25 }
  0x6f   :  { %1486 = vmatpush3.bf16.msra.mxu1 %v1688_v35  ;;  %v130_v35 = vrot.slane %v117_v17, %v129_v28  ;;  %v1766_v17 = vld [vmem:[#allocation8 + $0x58] sm:$0xff]  }
  0x70   :  { %1487 = vmatprep.subr.bf16.mxu1 %v1692_v36 }
  0x71   :  { %861 = vmatpush1.bf16.msra.mxu0 %v1663_v29 }
  0x72   :  { %862 = vmatprep.subr.bf16.mxu0 %v1668_v30 }
  0x73   :  { %1488 = vmatpush3.bf16.msra.mxu1 %v1693_v39  ;;  %v1730_v39 = vld [vmem:[#allocation7 + $0x19c] ss:$12 sps:$4 sm:$0xff]  }
  0x74   :  { %1489 = vmatprep.subr.bf16.mxu1 %v1697_v40 }
  0x75   :  { %863 = vmatpush1.bf16.msra.mxu0 %v1666_v33 }
  0x76   :  { %864 = vmatprep.subr.bf16.mxu0 %v1671_v34 }
  0x77   :  { %1490 = vmatpush3.bf16.msra.mxu1 %v1698_v44  ;;  %v1731_v44 = vld [vmem:[#allocation7 + $0x1a0] ss:$12 sps:$4 sm:$0xff]  }
  0x78   :  { %1491 = vmatprep.subr.bf16.mxu1 %v1702_v46  ;;  %v1734_v46 = vld [vmem:[#allocation7 + $0x1b4] ss:$12 sps:$4 sm:$0xff]  }
  0x79   :  { %865 = vmatpush1.bf16.msra.mxu0 %v1669_v37  ;;  %v1724_v37 = vld [vmem:[#allocation7 + $0x180] ss:$12 sps:$4 sm:$0xff]  }
  0x7a   :  { %866 = vmatprep.subr.bf16.mxu0 %v1674_v38  ;;  %v1727_v38 = vld [vmem:[#allocation7 + $0x188] ss:$12 sps:$4 sm:$0xff]  }
  0x7b   :  { %1492 = vmatpush3.bf16.msra.mxu1 %v1703_v47 }
  0x7c   :  { %1493 = vmatprep.subr.bf16.mxu1 %v1707_v48 }
  0x7d   :  { %867 = vmatpush1.bf16.msra.mxu0 %v1672_v41 }
  0x7e   :  { %868 = vmatprep.subr.bf16.mxu0 %v1677_v42 }
  0x7f   :  { %1494 = vmatpush3.bf16.msra.mxu1 %v1708_v51  ;;  %v1732_v51 = vld [vmem:[#allocation7 + $0x1b0] ss:$12 sps:$4 sm:$0xff]  }
  0x80   :  { %1495 = vmatprep.subr.bf16.mxu1 %v1712_v52  ;;  %v1735_v52 = vld [vmem:[#allocation7 + $0x1b8] ss:$12 sps:$4 sm:$0xff]  }
  0x81   :  { %869 = vmatpush1.bf16.msra.mxu0 %v1675_v43  ;;  %v1728_v43 = vld [vmem:[#allocation7 + $0x198] ss:$12 sps:$4 sm:$0xff]  }
  0x82   :  { %870 = vmatprep.subr.bf16.mxu0 %v1680_v45 }
  0x83   :  { %1496 = vmatpush3.bf16.msra.mxu1 %v1713_v55  ;;  %v1736_v55 = vld [vmem:[#allocation7 + $0x1c8] ss:$12 sps:$4 sm:$0xff]  }
  0x84   :  { %1497 = vmatprep.subr.bf16.mxu1 %v1717_v6  ;;  %v1756_v6 = vld [vmem:[#allocation8 + $0x80] sm:$0xff]  }
  0x85   :  { %871 = vmatpush1.bf16.msra.mxu0 %v1678_v49 }
  0x86   :  { %872 = vmatprep.subr.bf16.mxu0 %v1683_v50 }
  0x87   :  { %1498 = vmatpush3.bf16.msra.mxu1 %v1718_v8  ;;  %v1758_v8 = vld [vmem:[#allocation8] sm:$0xff]  }
  0x88   :  { %1499 = vmatprep.subr.bf16.mxu1 %v1722_v10  ;;  %v1759_v10 = vld [vmem:[#allocation8 + $0x88] sm:$0xff]  }
  0x89   :  { %873 = vmatpush1.bf16.msra.mxu0 %v1681_v53  ;;  %v1738_v53 = vld [vmem:[#allocation7 + $0x1cc] ss:$12 sps:$4 sm:$0xff]  }
  0x8a   :  { %874 = vmatprep.subr.bf16.mxu0 %v1686_v54 }
  0x8b   :  { %1500 = vmatpush3.bf16.msra.mxu1 %v1723_v12  ;;  %v1763_v12 = vld [vmem:[#allocation8 + $0x50] sm:$0xff]  }
  0x8c   :  { %1567 = vmatprep.subr.bf16.mxu1 %v1906_v0 }
  0x8d   :  { %875 = vmatpush1.bf16.msra.mxu0 %v1684_v56  ;;  %v1739_v56 = vld [vmem:[#allocation7 + $0x1d0] ss:$12 sps:$4 sm:$0xff]  }
  0x8e   :  { %876 = vmatprep.subr.bf16.mxu0 %v1691_v57  ;;  %v1740_v57 = vld [vmem:[#allocation7 + $0x1e0] ss:$12 sps:$4 sm:$0xff]  }
  0x91   :  { %877 = vmatpush1.bf16.msra.mxu0 %v1689_v58  ;;  %v1743_v58 = vld [vmem:[#allocation7 + $0x1e8] ss:$12 sps:$4 sm:$0xff]  }
  0x92   :  { %878 = vmatprep.subr.bf16.mxu0 %v1696_v59  ;;  %v1746_v59 = vld [vmem:[#allocation7 + $0x1fc] ss:$12 sps:$4 sm:$0xff]  }
  0x95   :  { %879 = vmatpush1.bf16.msra.mxu0 %v1694_v60  ;;  %v1744_v60 = vld [vmem:[#allocation7 + $0x1f8] ss:$12 sps:$4 sm:$0xff]  }
  0x96   :  { %880 = vmatprep.subr.bf16.mxu0 %v1701_v61  ;;  %v1747_v61 = vld [vmem:[#allocation7 + $0x200] ss:$12 sps:$4 sm:$0xff]  }
  0x99   :  { %881 = vmatpush1.bf16.msra.mxu0 %v1699_v62  ;;  %v1750_v62 = vld [vmem:[#allocation7 + $0x214] ss:$12 sps:$4 sm:$0xff]  }
  0x9a   :  { %882 = vmatprep.subr.bf16.mxu0 %v1706_v63  ;;  %v1748_v63 = vld [vmem:[#allocation7 + $0x210] ss:$12 sps:$4 sm:$0xff]  }
  0x9d   :  { %883 = vmatpush1.bf16.msra.mxu0 %v1704_v2  ;;  %v1751_v2 = vld [vmem:[#allocation7 + $0x218] ss:$12 sps:$4 sm:$0xff]  }
  0x9e   :  { %884 = vmatprep.subr.bf16.mxu0 %v1711_v3  ;;  %v1754_v3 = vld [vmem:[#allocation7 + $0x22c] ss:$12 sps:$4 sm:$0xff]  }
  0xa1   :  { %885 = vmatpush1.bf16.msra.mxu0 %v1709_v4  ;;  %v1752_v4 = vld [vmem:[#allocation7 + $0x228] ss:$12 sps:$4 sm:$0xff]  }
  0xa2   :  { %886 = vmatprep.subr.bf16.mxu0 %v1716_v5  ;;  %v1755_v5 = vld [vmem:[#allocation7 + $0x230] ss:$12 sps:$4 sm:$0xff]  }
  0xa5   :  { %887 = vmatpush1.bf16.msra.mxu0 %v1714_v7  ;;  %v1757_v7 = vld [vmem:[#allocation8 + $0x40] sm:$0xff]  }
  0xa6   :  { %888 = vmatprep.subr.bf16.mxu0 %v1721_v9  ;;  %v1760_v9 = vld [vmem:[#allocation8 + $0x48] sm:$0xff]  }
  0xa9   :  { %889 = vmatpush1.bf16.msra.mxu0 %v1719_v11  ;;  %v1761_v11 = vld [vmem:[#allocation8 + $0x8] sm:$0xff]  }
  0xaa   :  { %901 = vmatprep.subr.bf16.mxu0 %v1726_v13  ;;  %v1762_v13 = vld [vmem:[#allocation8 + $0x90] sm:$0xff]  }
 0x13f   :  { %v302_v21 = vpop.f32.mrb[0].mxu0 }
 0x140   :  { %v303_v22 = vadd.f32 %v302_v21, %v122_v19  ;;  %v304_v23 = vpop.f32.mrb[1].mxu0  ;;  %v1769_v21 = vld [vmem:[#allocation8 + $0x60] sm:$0xff]  }
 0x141   :  { %v305_v24 = vadd.f32 %v304_v23, %v126_v20  ;;  %v306_v25 = vpop.f32.mrb[2].mxu0  ;;  %v345_v40 = vpop.f32.mrb[0].mxu1  ;;  %v1770_v23 = vld [vmem:[#allocation8 + $0x20] sm:$0xff]  }
 0x142   :  { %v307_v26 = vadd.f32 %v306_v25, %v122_v19  ;;  %v308_v27 = vpop.f32.mrb[3].mxu0  ;;  %v352_v30 = vmax.f32 %v303_v22, 0.0  ;;  %v346_v41 = vadd.f32 %v345_v40, %v130_v35  ;;  %v1565_v42 = vpop.f32.mrb[1].mxu1  ;;  %v1765_v19 = vld [vmem:[#allocation8 + $0x98] sm:$0xff]   ;;  %v1768_v22 = vld [vmem:[#allocation8 + $0xa0] sm:$0xff]   ;;  %v1771_v25 = vld [vmem:[#allocation8 + $0xa8] sm:$0xff]  }
 0x143   :  { %v309_v29 = vadd.f32 %v308_v27, %v126_v20  ;;  %v353_v32 = vmax.f32 %v305_v24, 0.0  ;;  %v348_v45 = vpop.f32.mrb[2].mxu1  ;;  %v1767_v20 = vld [vmem:[#allocation8 + $0x18] sm:$0xff]   ;;  %v1772_v24 = vld [vmem:[#allocation8 + $0x68] sm:$0xff]   ;;  %v1774_v27 = vld [vmem:[#allocation8 + $0xb0] sm:$0xff]  }
 0x144   :  { %v355_v31 = vmax.f32 %v307_v26, 0.0  ;;  %v354_v47 = vmax.f32 %v346_v41, 0.0  ;;  %v349_v48 = vadd.f32 %v348_v45, %v130_v35  ;;  %v1566_v49 = vpop.f32.mrb[3].mxu1  ;;  %v1773_v26 = vld [vmem:[#allocation8 + $0x28] sm:$0xff]   ;;  %v457_v40 = vld [vmem:[%s2094_s4] sm:$0x7] }
 0x145   :  { %v356_v33 = vmax.f32 %v309_v29, 0.0  ;;  %v1775_v29 = vld [vmem:[#allocation8 + $0x70] sm:$0xff]   ;;  %v462_v41 = vrot.slane %v457_v40, %v121_v16  ;;  %v466_v42 = vrot.slane %v457_v40, %v125_v18 }
 0x146   :  { %v358_v34 = vpack.c.bf16 %v355_v31, %v352_v30  ;;  %v357_v50 = vmax.f32 %v349_v48, 0.0  ;;  %v1776_v30 = vld [vmem:[#allocation8 + $0x30] sm:$0xff]   ;;  %v1777_v31 = vld [vmem:[#allocation8 + $0xb8] sm:$0xff]  }
 0x147   :  { %v359_v36 = vpack.c.bf16 %v356_v33, %v353_v32  ;;  %v1778_v32 = vld [vmem:[#allocation8 + $0x78] sm:$0xff]  }
 0x148   :  { %v360_v54 = vpack.c.bf16 %v357_v50, %v354_v47  ;;  %v1779_v33 = vld [vmem:[#allocation8 + $0x38] sm:$0xff]  }
 0x149   :  { %890 = vmatprep.mubr.bf16.mxu0 %v359_v36  ;;  %976 = vmatprep.mubr.bf16.mxu1 %v359_v36 }
 0x14a   :  { %891 = vmatmul.mubr.bf16.vlgmr.msra.gmra.mrb[4].mxu0 %v358_v34  ;;  %977 = vmatmul.mubr.bf16.vlgmr.msra.gmra.mrb[4].mxu1 %v358_v34 }
 0x14b   :  { %902 = vmatpush1.bf16.msra.mxu0 %v1724_v37  ;;  %1568 = vmatpush3.bf16.msra.mxu1 %v1727_v38 }
 0x14c   :  { %903 = vmatprep.subr.bf16.mxu0 %v1730_v39  ;;  %1569 = vmatprep.subr.bf16.mxu1 %v1906_v0 }
 0x14d   :  { %933 = vmatprep.mubr.bf16.mxu0 %v1907_v1  ;;  %1583 = vmatprep.mubr.msk.bf16.mxu1 %vm1908_vm0, %v1906_v0  ;;  %v1742_v1 = vld [vmem:[#allocation7 + $0x1e4] ss:$12 sps:$4 sm:$0xff]  }
 0x14f   :  { %904 = vmatpush1.bf16.msra.mxu0 %v1728_v43  ;;  %1570 = vmatpush3.bf16.msra.mxu1 %v1731_v44 }
 0x150   :  { %905 = vmatprep.subr.bf16.mxu0 %v1734_v46  ;;  %1571 = vmatprep.subr.bf16.mxu1 %v1906_v0 }
 0x153   :  { %906 = vmatpush1.bf16.msra.mxu0 %v1732_v51  ;;  %1572 = vmatpush3.bf16.msra.mxu1 %v1735_v52 }
 0x154   :  { %907 = vmatprep.subr.bf16.mxu0 %v1738_v53  ;;  %1573 = vmatprep.subr.bf16.mxu1 %v1906_v0 }
 0x157   :  { %908 = vmatpush1.bf16.msra.mxu0 %v1736_v55  ;;  %1574 = vmatpush3.bf16.msra.mxu1 %v1739_v56 }
 0x158   :  { %909 = vmatprep.subr.bf16.mxu0 %v1742_v1  ;;  %1575 = vmatprep.subr.bf16.mxu1 %v1906_v0 }
 0x15b   :  { %910 = vmatpush1.bf16.msra.mxu0 %v1740_v57  ;;  %1576 = vmatpush3.bf16.msra.mxu1 %v1743_v58 }
 0x15c   :  { %911 = vmatprep.subr.bf16.mxu0 %v1746_v59  ;;  %1577 = vmatprep.subr.bf16.mxu1 %v1906_v0 }
 0x15f   :  { %912 = vmatpush1.bf16.msra.mxu0 %v1744_v60  ;;  %1578 = vmatpush3.bf16.msra.mxu1 %v1747_v61 }
 0x160   :  { %913 = vmatprep.subr.bf16.mxu0 %v1750_v62  ;;  %1579 = vmatprep.subr.bf16.mxu1 %v1906_v0 }
 0x163   :  { %914 = vmatpush1.bf16.msra.mxu0 %v1748_v63  ;;  %1580 = vmatpush3.bf16.msra.mxu1 %v1751_v2 }
 0x164   :  { %915 = vmatprep.subr.bf16.mxu0 %v1754_v3  ;;  %1581 = vmatprep.subr.bf16.mxu1 %v1906_v0 }
 0x167   :  { %916 = vmatpush1.bf16.msra.mxu0 %v1752_v4  ;;  %1582 = vmatpush3.bf16.msra.mxu1 %v1755_v5  ;;  %v1442_v5 = vld [vmem:[%s2096_s6] ss:$0 sm:$0xff] }
 0x168   :  { %1587 = vmatprep.subr.bf16.mxu0 %v1906_v0  ;;  %1516 = vmatprep.subr.bf16.mxu1 %v1757_v7 }
 0x16a   :  { %934 = vmatmul.mubr.bf16.vlgmr.msra.gmra.mrb[4].mxu0 %v360_v54  ;;  %1584 = vmatmul.mubr.bf16.vlgmr.msra.gmra.mrb[8].mxu1 %v360_v54 }
 0x16b   :  { %1603 = vmatprep.mubr.msk.bf16.mxu0 %vm1908_vm0, %v1906_v0  ;;  %1588 = vmatpush3.bf16.msra.mxu0 %v1756_v6 }
 0x16c   :  { %1517 = vmatpush3.bf16.msra.mxu1 %v1758_v8  ;;  %1589 = vmatprep.subr.bf16.mxu0 %v1906_v0 }
 0x16d   :  { %1518 = vmatprep.subr.bf16.mxu1 %v1760_v9 }
 0x16f   :  { %1590 = vmatpush3.bf16.msra.mxu0 %v1759_v10 }
 0x170   :  { %1519 = vmatpush3.bf16.msra.mxu1 %v1761_v11  ;;  %1591 = vmatprep.subr.bf16.mxu0 %v1906_v0 }
 0x171   :  { %1520 = vmatprep.subr.bf16.mxu1 %v1763_v12 }
 0x173   :  { %1592 = vmatpush3.bf16.msra.mxu0 %v1762_v13 }
 0x174   :  { %1521 = vmatpush3.bf16.msra.mxu1 %v1764_v14  ;;  %1593 = vmatprep.subr.bf16.mxu0 %v1906_v0 }
 0x175   :  { %1522 = vmatprep.subr.bf16.mxu1 %v1766_v17 }
 0x177   :  { %1594 = vmatpush3.bf16.msra.mxu0 %v1765_v19 }
 0x178   :  { %1523 = vmatpush3.bf16.msra.mxu1 %v1767_v20  ;;  %1595 = vmatprep.subr.bf16.mxu0 %v1906_v0 }
 0x179   :  { %1524 = vmatprep.subr.bf16.mxu1 %v1769_v21 }
 0x17b   :  { %1596 = vmatpush3.bf16.msra.mxu0 %v1768_v22 }
 0x17c   :  { %1525 = vmatpush3.bf16.msra.mxu1 %v1770_v23  ;;  %1597 = vmatprep.subr.bf16.mxu0 %v1906_v0 }
 0x17d   :  { %1526 = vmatprep.subr.bf16.mxu1 %v1772_v24 }
 0x17f   :  { %1598 = vmatpush3.bf16.msra.mxu0 %v1771_v25 }
 0x180   :  { %1599 = vmatprep.subr.bf16.mxu0 %v1906_v0  ;;  %1527 = vmatpush3.bf16.msra.mxu1 %v1773_v26 }
 0x181   :  { %1528 = vmatprep.subr.bf16.mxu1 %v1775_v29 }
 0x183   :  { %1600 = vmatpush3.bf16.msra.mxu0 %v1774_v27 }
 0x184   :  { %1601 = vmatprep.subr.bf16.mxu0 %v1906_v0  ;;  %1529 = vmatpush3.bf16.msra.mxu1 %v1776_v30  ;;  %v470_v0 = vrot.slane %v457_v40, %v129_v28 }
 0x185   :  { %1530 = vmatprep.subr.bf16.mxu1 %v1778_v32 }
 0x187   :  { %1602 = vmatpush3.bf16.msra.mxu0 %v1777_v31 }
 0x188   :  { %1531 = vmatpush3.bf16.msra.mxu1 %v1779_v33 }
 0x21d   :  { %v1501_v34 = vpop.f32.mrb[4].mxu1 }
 0x21e   :  { %v1502_v35 = vpop.f32.mrb[5].mxu1 }
 0x21f   :  { %v1503_v36 = vadd.f32 %v1502_v35, %v1501_v34  ;;  %v1504_v37 = vpop.f32.mrb[6].mxu1 }
 0x220   :  { %v1505_v38 = vpop.f32.mrb[7].mxu1 }
 0x221   :  { %v1506_v39 = vadd.f32 %v1505_v38, %v1504_v37  ;;  %v979_v43 = vadd.f32 %v1503_v36, %v470_v0 }
 0x223   :  { %v982_v50 = vadd.f32 %v1506_v39, %v470_v0 }
 0x23d   :  { %v935_v44 = vpop.f32.mrb[4].mxu0  ;;  %v1019_v45 = vpop.f32.mrb[8].mxu1 }
 0x23e   :  { %v1607_v46 = vadd.f32 %v935_v44, %v462_v41  ;;  %v1020_v47 = vadd.f32 %v1019_v45, %v979_v43  ;;  %v937_v48 = vpop.f32.mrb[5].mxu0  ;;  %v1585_v49 = vpop.f32.mrb[9].mxu1 }
 0x23f   :  { %v1608_v51 = vadd.f32 %v937_v48, %v466_v42  ;;  %v939_v52 = vpop.f32.mrb[6].mxu0  ;;  %v1022_v53 = vpop.f32.mrb[10].mxu1 }
 0x240   :  { %v1609_v54 = vadd.f32 %v939_v52, %v462_v41  ;;  %v1023_v55 = vadd.f32 %v1022_v53, %v982_v50  ;;  %v941_v28 = vpop.f32.mrb[7].mxu0  ;;  %v1586_v56 = vpop.f32.mrb[11].mxu1  ;;  %v1026_v16 = vmax.f32 %v1607_v46, 0.0  ;;  %v1028_v57 = vmax.f32 %v1020_v47, 0.0 }
 0x241   :  { %v1610_v1 = vadd.f32 %v941_v28, %v466_v42  ;;  %v1027_v58 = vmax.f32 %v1608_v51, 0.0 }
 0x242   :  { %v1029_v15 = vmax.f32 %v1609_v54, 0.0  ;;  %v1031_v18 = vmax.f32 %v1023_v55, 0.0 }
 0x243   :  { %v1030_v59 = vmax.f32 %v1610_v1, 0.0 }
 0x244   :  { %v1032_v60 = vpack.c.bf16 %v1029_v15, %v1026_v16  ;;  %v1034_v61 = vpack.c.bf16 %v1031_v18, %v1028_v57 }
 0x245   :  { %v1033_v62 = vpack.c.bf16 %v1030_v59, %v1027_v58 }
 0x246   :  { %1604 = vmatmul.mubr.bf16.vlgmr.msra.gmra.mrb[8].mxu0 %v1034_v61 }
 0x247   :  { %1266 = vmatprep.mubr.bf16.mxu1 %v1033_v62 }
 0x248   :  { %1267 = vmatmul.mubr.bf16.vlgmr.msra.gmra.mrb[12].mxu1 %v1032_v60 }
 0x319   :  { %v1309_v63 = vpop.f32.mrb[8].mxu0 }
 0x31a   :  { %v1605_v2 = vpop.f32.mrb[9].mxu0 }
 0x31b   :  { %v1532_v3 = vpop.f32.mrb[12].mxu1  ;;  %v1312_v4 = vpop.f32.mrb[10].mxu0 }
 0x31c   :  { %v1533_v6 = vpop.f32.mrb[13].mxu1  ;;  %v1606_v7 = vpop.f32.mrb[11].mxu0 }
 0x31d   :  { %v1534_v8 = vadd.f32 %v1533_v6, %v1532_v3  ;;  %v1535_v9 = vpop.f32.mrb[14].mxu1 }
 0x31e   :  { %v1536_v10 = vpop.f32.mrb[15].mxu1 }
 0x31f   :  { %v1269_v11 = vadd.f32 %v1534_v8, %v1442_v5  ;;  %v1537_v12 = vadd.f32 %v1536_v10, %v1535_v9 }
 0x321   :  { %v1310_v13 = vadd.f32 %v1309_v63, %v1269_v11  ;;  %v1272_v14 = vadd.f32 %v1537_v12, %v1442_v5 }
 0x323   :  { %v1313_v17 = vadd.f32 %v1312_v4, %v1272_v14 }
 0x325   :  { %v1474_v19 = vpack.c.bf16 %v1313_v17, %v1310_v13 }
 0x327   :  { %1475 = vst [vmem:[#allocation10] sm:$0xff] %v1474_v19  }
 0x328   :  { %1879 = shalt.err (!%p1876_p8)
}
 0x329   :  { %s1880_s14 = scalar_lea.hbm %s2097_s7, 128 }
 0x32a   :  { %p1881_p9 = scmp.ne.s32.totalorder %s2097_s7, %s1880_s14  ;;  %p1884_p10 = scmp.lt.u32.totalorder %s1880_s14, %s2097_s7 }
 0x32c   :  { %p1886_p11 = pnand %p1884_p10, %p1881_p9 }
 0x32e   :  { %1889 = shalt.err (!%p1886_p11)
}
 0x32f   :  { %1337 = dma.vmem_to_hbm [thread:$0]  %s1332_s9, 128, %s2097_s7, [#allocation4], %s1902_s1, %s1902_s1, %s1903_s25  }
 0x330   :  { %1896 = dma.done.wait [#allocation4], 128  }
 0x331   :  { %1897 = vsyncadd [#allocation4], 4294967168 }
 0x332   :  { %1341 = vsyncpa [#allocation3], 1 }
 0x333   :  { %1342 = vsyncpa [#allocation6], 1 }
 0x334   :  { %1343 = vsyncpa [#allocation9], 1 }
 0x335   :  { %1344 = vsyncpa [#allocation4], 1 }

</bundles_post_ra>
